<compile_context>
chip_gen: v7x
topology: tpu7x:2x2x1
jax: 0.10.0
libtpu: 0.0.40
codegen_flags: <defaults>
</compile_context>

<pallas_src>
import functools

import jax
import jax.numpy as jnp
import numpy as np
from jax.experimental import pallas as pl
from jax.experimental.pallas import tpu as pltpu


def _multiloss_kernel(logits_ref, label_ref, area_gt_ref, area_seg_ref, ce_ref,
                      *, total_pixels):
    # logits_ref : (1, C, TP)  native dtype -- one pixel tile of one batch elem
    # label_ref  : (1, 1, TP)  int32 (tail lanes of the last tile are garbage)
    # area_gt_ref, area_seg_ref : (1, 1, C, 1) f32 accumulators (VMEM-resident)
    # ce_ref     : (1, 1, 1, 1) f32 accumulator (sum of per-pixel CE)
    C = logits_ref.shape[1]
    TP = logits_ref.shape[2]
    t = pl.program_id(2)

    @pl.when(t == 0)
    def _init():
        area_gt_ref[...] = jnp.zeros_like(area_gt_ref)
        area_seg_ref[...] = jnp.zeros_like(area_seg_ref)
        ce_ref[...] = jnp.zeros_like(ce_ref)

    # Global pixel position of every lane in this tile; masks both the ragged
    # tail of the last tile and the (clamped) duplicate tile of an odd split.
    tile_global = pl.program_id(0) * pl.num_programs(2) + t
    lane = jax.lax.broadcasted_iota(jnp.int32, (1, TP), 1)
    valid = (tile_global * TP + lane) < total_pixels              # (1, TP) bool

    logits = logits_ref[0].astype(jnp.float32)                    # (C, TP)
    labels = label_ref[0]                                         # (1, TP) int32

    # Tiny (C, 1) class-id column broadcast against the (1, TP) labels.
    cls = jax.lax.broadcasted_iota(jnp.int32, (C, 1), 0)
    gt_mask = jnp.logical_and(labels == cls, valid)               # (C, TP) bool

    # ---- softmax statistics over the class (sublane) axis ----
    m = jnp.max(logits, axis=0, keepdims=True)                    # (1, TP)
    e = jnp.exp(logits - m)                                       # (C, TP)
    denom = jnp.sum(e, axis=0, keepdims=True)                     # (1, TP)
    recip = pl.reciprocal(denom, approx=True)                     # EUP slot
    logsumexp = m + jnp.log(denom)                                # (1, TP)

    # Logit at the ground-truth class (masked row select; OOB lanes -> 0,
    # selects never propagate NaN/Inf from undefined tail data).
    label_logit = jnp.sum(jnp.where(gt_mask, logits, 0.0), axis=0, keepdims=True)

    # Pixel-wise cross entropy, summed over this tile (tail lanes masked out).
    pix_ce = jnp.where(valid, logsumexp - label_logit, 0.0)       # (1, TP)
    ce_ref[0, 0] += jnp.sum(pix_ce, axis=1, keepdims=True)        # (1, 1)

    # Prediction == label  <=>  the label-class logit attains the per-pixel max.
    # At the max class the (stable) softmax prob is exp(0)/denom = 1/denom.
    correct = label_logit == m                                    # (1, TP) bool
    seg_val = jnp.where(correct, recip, 0.0)                      # (1, TP)

    area_gt_ref[0, 0] += jnp.sum(jnp.where(gt_mask, 1.0, 0.0),
                                 axis=1, keepdims=True)           # (C, 1)
    area_seg_ref[0, 0] += jnp.sum(jnp.where(gt_mask, seg_val, 0.0),
                                  axis=1, keepdims=True)          # (C, 1)

    @pl.when(t == pl.num_programs(2) - 1)
    def _finalize():
        inv_pix = jnp.float32(1.0 / total_pixels)
        area_gt_ref[...] = area_gt_ref[...] * inv_pix
        area_seg_ref[...] = area_seg_ref[...] * inv_pix


def _choose_pixel_tile(P, C, itemsize, batch, max_tile_bytes=2 * 1024 * 1024):
    """Lane-dense pixel tile from a VMEM byte budget (multiple of 128 or == P)."""
    tp = (max_tile_bytes // max(1, C * itemsize)) // 128 * 128
    tp = max(tp, 2048)                       # amortize ~0.35us/step grid overhead
    if batch == 1:
        # Keep >= 2 pixel tiles so the leading split axis can feed both
        # TensorCores on dual-core chips (v7x) even at batch 1.
        half = ((P + 1) // 2 + 127) // 128 * 128
        tp = min(tp, max(half, 128))
    if P <= tp:
        return int(P)
    return int(tp)


def multi_loss(predict_output, predict_area, label, tile_pixels=None,
               max_tile_bytes=2 * 1024 * 1024):
    """predict_output: (N, C, H, W); predict_area: (N, C); label: (N, H, W) int."""
    N, C, H, W = predict_output.shape
    P = H * W
    # Pass logits in their native dtype (f32/bf16); cast per-tile in the kernel.
    logits = predict_output.reshape(N, C, P)
    lbl = label.reshape(N, 1, P).astype(jnp.int32)

    itemsize = np.dtype(predict_output.dtype).itemsize
    if tile_pixels is None:
        TP = _choose_pixel_tile(P, C, itemsize, N, max_tile_bytes)
    else:
        assert tile_pixels >= P or tile_pixels % 128 == 0, (
            "tile_pixels must be a multiple of 128 or >= H*W")
        TP = int(min(tile_pixels, P))

    num_tiles = pl.cdiv(P, TP)
    # Leading 2-way split of the pixel-tile axis (megacore on dual-core chips).
    S = 2 if num_tiles >= 2 else 1
    tps = pl.cdiv(num_tiles, S)
    last_tile = num_tiles - 1

    # Pixel block index for (split, batch, tile); clamped so the odd-tile-count
    # case never issues a fully out-of-bounds DMA (the duplicate tile is zeroed
    # in-kernel by the lane-position mask).
    def pix_block(s, b, t):
        return (b, 0, jnp.minimum(s * tps + t, last_tile))

    kernel = functools.partial(_multiloss_kernel, total_pixels=int(P))

    area_gt, area_seg, ce_sum = pl.pallas_call(
        kernel,
        out_shape=(
            jax.ShapeDtypeStruct((S, N, C, 1), jnp.float32),
            jax.ShapeDtypeStruct((S, N, C, 1), jnp.float32),
            jax.ShapeDtypeStruct((S, N, 1, 1), jnp.float32),
        ),
        grid=(S, N, tps),
        in_specs=[
            pl.BlockSpec((1, C, TP), pix_block),
            pl.BlockSpec((1, 1, TP), pix_block),
        ],
        out_specs=(
            pl.BlockSpec((1, 1, C, 1), lambda s, b, t: (s, b, 0, 0)),
            pl.BlockSpec((1, 1, C, 1), lambda s, b, t: (s, b, 0, 0)),
            pl.BlockSpec((1, 1, 1, 1), lambda s, b, t: (s, b, 0, 0)),
        ),
        compiler_params=pltpu.CompilerParams(
            dimension_semantics=("parallel", "parallel", "arbitrary"),
            vmem_limit_bytes=48 * 1024 * 1024,   # <= v7x's 64 MiB physical VMEM
        ),
    )(logits, lbl)

    # Combine the two split halves; already divided by H*W in-kernel.
    area_gt = jnp.sum(area_gt, axis=0)[..., 0]      # (N, C)
    area_seg = jnp.sum(area_seg, axis=0)[..., 0]    # (N, C)

    pix = jnp.float32(P)
    ce_loss = jnp.sum(ce_sum) / (jnp.float32(N) * pix)   # mean over N*H*W pixels
    pa = predict_area.astype(jnp.float32) / pix

    mse = lambda a, b: jnp.mean((a - b) ** 2)
    segment_gt_area_loss = mse(area_seg, area_gt)
    estimate_gt_area_loss = mse(pa, area_gt)
    segment_estimate_area_loss = mse(area_seg, pa)
    return (ce_loss
            + 0.05 * segment_gt_area_loss
            + 0.5 * estimate_gt_area_loss
            + segment_estimate_area_loss)


def multi_loss_ref(po, pa, label):
    """Pure-JAX reference mirroring the PyTorch forward."""
    N, C, H, W = po.shape
    pix = jnp.float32(H * W)
    onehot = jax.nn.one_hot(label, C, axis=1)                      # (N, C, H, W)
    area_gt = onehot.sum(axis=(2, 3)) / pix
    sm = jax.nn.softmax(po, axis=1)
    idx = jnp.argmax(sm, axis=1)
    pred_onehot = jax.nn.one_hot(idx, C, axis=1)
    area_seg = (pred_onehot * onehot * sm).sum(axis=(2, 3)) / pix
    pa = pa / pix
    logp = jax.nn.log_softmax(po, axis=1)
    ce = -jnp.mean(jnp.sum(onehot * logp, axis=1))
    mse = lambda a, b: jnp.mean((a - b) ** 2)
    return ce + 0.05 * mse(area_seg, area_gt) + 0.5 * mse(pa, area_gt) + mse(area_seg, pa)


if __name__ == "__main__":
    key = jax.random.PRNGKey(0)
    k1, k2, k3 = jax.random.split(key, 3)

    # Small deterministic example: batch=2, classes=4, spatial 16x16 (single tile).
    N, C, H, W = 2, 4, 16, 16
    predict_output = jax.random.normal(k1, (N, C, H, W), dtype=jnp.float32)
    predict_area = jax.random.normal(k2, (N, C), dtype=jnp.float32)
    label = jax.random.randint(k3, (N, H, W), 0, C, dtype=jnp.int32)

    loss = multi_loss(predict_output, predict_area, label)
    jax.block_until_ready(loss)
    ref = multi_loss_ref(predict_output, predict_area, label)
    # Tolerance covers the approximate EUP reciprocal feeding area_segment.
    np.testing.assert_allclose(np.asarray(loss), np.asarray(ref), rtol=1e-3, atol=1e-3)

    # Exercise the multi-tile path: ragged last tile, odd tile count, 2-way split
    # with one clamped duplicate tile (batch=1, P=1600, TP=640 -> 3 tiles).
    N2, C2, H2, W2 = 1, 4, 40, 40
    po2 = jax.random.normal(k1, (N2, C2, H2, W2), dtype=jnp.float32)
    pa2 = jax.random.normal(k2, (N2, C2), dtype=jnp.float32)
    lb2 = jax.random.randint(k3, (N2, H2, W2), 0, C2, dtype=jnp.int32)
    loss2 = multi_loss(po2, pa2, lb2, tile_pixels=640)
    jax.block_until_ready(loss2)
    ref2 = multi_loss_ref(po2, pa2, lb2)
    np.testing.assert_allclose(np.asarray(loss2), np.asarray(ref2), rtol=1e-3, atol=1e-3)

    print("KERNEL_OK")
</pallas_src>

<mosaic_0001>
module attributes {stable_mosaic.version = 11 : i64} {
  func.func @_multiloss_kernel(%arg0: i32, %arg1: i32, %arg2: i32, %arg3: memref<1x4x256xf32, #tpu.memory_space<vmem>>, %arg4: memref<1x1x256xi32, #tpu.memory_space<vmem>>, %arg5: memref<1x1x4x1xf32, #tpu.memory_space<vmem>>, %arg6: memref<1x1x4x1xf32, #tpu.memory_space<vmem>>, %arg7: memref<1x1x1x1xf32, #tpu.memory_space<vmem>>) attributes {dimension_semantics = [#tpu.dimension_semantics<parallel>, #tpu.dimension_semantics<parallel>, #tpu.dimension_semantics<arbitrary>], iteration_bounds = array<i64: 1, 2, 1>, scalar_prefetch = 0 : i64, scratch_operands = 0 : i64, tpu.core_type = #tpu.core_type<tc>, window_params = [{transform_indices = @transform_0, window_bounds = array<i64: 1, 4, 256>}, {transform_indices = @transform_1, window_bounds = array<i64: 1, 1, 256>}, {transform_indices = @transform_2, window_bounds = array<i64: 1, 1, 4, 1>}, {transform_indices = @transform_3, window_bounds = array<i64: 1, 1, 4, 1>}, {transform_indices = @transform_4, window_bounds = array<i64: 1, 1, 1, 1>}]} {
    %c0_i32 = arith.constant 0 : i32
    %0 = arith.cmpi eq, %arg2, %c0_i32 : i32
    %1 = arith.extui %0 : i1 to i32
    %c0_i32_0 = arith.constant 0 : i32
    %2 = arith.cmpi ne, %1, %c0_i32_0 : i32
    scf.if %2 {
      %cst_44 = arith.constant 0.000000e+00 : f32
      %75 = vector.broadcast %cst_44 : f32 to vector<1x1x4x1xf32>
      %c0_45 = arith.constant 0 : index
      %c0_46 = arith.constant 0 : index
      %c0_47 = arith.constant 0 : index
      %c0_48 = arith.constant 0 : index
      %76 = vector.load %arg5[%c0_45, %c0_46, %c0_47, %c0_48] : memref<1x1x4x1xf32, #tpu.memory_space<vmem>>, vector<1x1x4x1xf32>
      tpu.vector_store %arg5[%c0_45, %c0_46, %c0_47, %c0_48], %75 {strides = array<i32>} : memref<1x1x4x1xf32, #tpu.memory_space<vmem>>, vector<1x1x4x1xf32>,
      %cst_49 = arith.constant 0.000000e+00 : f32
      %77 = vector.broadcast %cst_49 : f32 to vector<1x1x4x1xf32>
      %c0_50 = arith.constant 0 : index
      %c0_51 = arith.constant 0 : index
      %c0_52 = arith.constant 0 : index
      %c0_53 = arith.constant 0 : index
      %78 = vector.load %arg6[%c0_50, %c0_51, %c0_52, %c0_53] : memref<1x1x4x1xf32, #tpu.memory_space<vmem>>, vector<1x1x4x1xf32>
      tpu.vector_store %arg6[%c0_50, %c0_51, %c0_52, %c0_53], %77 {strides = array<i32>} : memref<1x1x4x1xf32, #tpu.memory_space<vmem>>, vector<1x1x4x1xf32>,
      %cst_54 = arith.constant 0.000000e+00 : f32
      %79 = vector.broadcast %cst_54 : f32 to vector<1x1x1x1xf32>
      %c0_55 = arith.constant 0 : index
      %c0_56 = arith.constant 0 : index
      %c0_57 = arith.constant 0 : index
      %c0_58 = arith.constant 0 : index
      %80 = vector.load %arg7[%c0_55, %c0_56, %c0_57, %c0_58] : memref<1x1x1x1xf32, #tpu.memory_space<vmem>>, vector<1x1x1x1xf32>
      tpu.vector_store %arg7[%c0_55, %c0_56, %c0_57, %c0_58], %79 {strides = array<i32>} : memref<1x1x1x1xf32, #tpu.memory_space<vmem>>, vector<1x1x1x1xf32>,
    } else {
    }
    %c1_i32 = arith.constant 1 : i32
    %3 = arith.muli %arg0, %c1_i32 : i32
    %4 = arith.addi %3, %arg2 : i32
    %5 = tpu.iota {dimensions = array<i32: 1>} : vector<1x256xi32>
    %c256_i32 = arith.constant 256 : i32
    %6 = arith.muli %4, %c256_i32 : i32
    %7 = vector.broadcast %6 : i32 to vector<1x256xi32>
    %8 = arith.addi %7, %5 : vector<1x256xi32>
    %c256_i32_1 = arith.constant 256 : i32
    %9 = vector.broadcast %c256_i32_1 : i32 to vector<1x256xi32>
    %10 = arith.cmpi slt, %8, %9 : vector<1x256xi32>
    %c0 = arith.constant 0 : index
    %c0_2 = arith.constant 0 : index
    %c0_3 = arith.constant 0 : index
    %11 = vector.load %arg3[%c0, %c0_2, %c0_3] : memref<1x4x256xf32, #tpu.memory_space<vmem>>, vector<1x4x256xf32>
    %12 = vector.shape_cast %11 : vector<1x4x256xf32> to vector<4x256xf32>
    %c0_4 = arith.constant 0 : index
    %c0_5 = arith.constant 0 : index
    %c0_6 = arith.constant 0 : index
    %13 = vector.load %arg4[%c0_4, %c0_5, %c0_6] : memref<1x1x256xi32, #tpu.memory_space<vmem>>, vector<1x1x256xi32>
    %14 = vector.shape_cast %13 : vector<1x1x256xi32> to vector<1x256xi32>
    %15 = tpu.iota {dimensions = array<i32: 0>} : vector<4x1xi32>
    %16 = vector.broadcast %14 : vector<1x256xi32> to vector<4x256xi32>
    %17 = vector.broadcast %15 : vector<4x1xi32> to vector<4x256xi32>
    %18 = arith.cmpi eq, %16, %17 : vector<4x256xi32>
    %19 = vector.broadcast %10 : vector<1x256xi1> to vector<4x256xi1>
    %20 = arith.andi %18, %19 : vector<4x256xi1>
    %cst = arith.constant dense<0xFF800000> : vector<256xf32>
    %21 = vector.multi_reduction <maximumf>, %12, %cst [0] : vector<4x256xf32> to vector<256xf32>
    %22 = vector.shape_cast %21 : vector<256xf32> to vector<1x256xf32>
    %23 = vector.broadcast %22 : vector<1x256xf32> to vector<4x256xf32>
    %24 = arith.subf %12, %23 : vector<4x256xf32>
    %25 = math.exp %24 : vector<4x256xf32>
    %cst_7 = arith.constant dense<0.000000e+00> : vector<256xf32>
    %26 = vector.multi_reduction <add>, %25, %cst_7 [0] : vector<4x256xf32> to vector<256xf32>
    %27 = vector.shape_cast %26 : vector<256xf32> to vector<1x256xf32>
    %28 = tpu.reciprocal %27 {approx = true} : vector<1x256xf32> -> vector<1x256xf32>
    %29 = math.log %27 : vector<1x256xf32>
    %30 = arith.addf %22, %29 : vector<1x256xf32>
    %cst_8 = arith.constant 0.000000e+00 : f32
    %31 = vector.broadcast %cst_8 : f32 to vector<4x256xf32>
    %32 = arith.select %20, %12, %31 : vector<4x256xi1>, vector<4x256xf32>
    %cst_9 = arith.constant dense<0.000000e+00> : vector<256xf32>
    %33 = vector.multi_reduction <add>, %32, %cst_9 [0] : vector<4x256xf32> to vector<256xf32>
    %34 = vector.shape_cast %33 : vector<256xf32> to vector<1x256xf32>
    %35 = arith.subf %30, %34 : vector<1x256xf32>
    %cst_10 = arith.constant 0.000000e+00 : f32
    %36 = vector.broadcast %cst_10 : f32 to vector<1x256xf32>
    %37 = arith.select %10, %35, %36 : vector<1x256xi1>, vector<1x256xf32>
    %c0_11 = arith.constant 0 : index
    %c0_12 = arith.constant 0 : index
    %c0_13 = arith.constant 0 : index
    %c0_14 = arith.constant 0 : index
    %38 = vector.load %arg7[%c0_11, %c0_12, %c0_13, %c0_14] : memref<1x1x1x1xf32, #tpu.memory_space<vmem>>, vector<1x1x1x1xf32>
    %39 = vector.shape_cast %38 : vector<1x1x1x1xf32> to vector<1x1xf32>
    %cst_15 = arith.constant dense<0.000000e+00> : vector<1xf32>
    %40 = vector.multi_reduction <add>, %37, %cst_15 [1] : vector<1x256xf32> to vector<1xf32>
    %41 = vector.shape_cast %40 : vector<1xf32> to vector<1x1xf32>
    %42 = arith.addf %39, %41 : vector<1x1xf32>
    %c0_16 = arith.constant 0 : index
    %c0_17 = arith.constant 0 : index
    %c0_18 = arith.constant 0 : index
    %c0_19 = arith.constant 0 : index
    %43 = vector.load %arg7[%c0_16, %c0_17, %c0_18, %c0_19] : memref<1x1x1x1xf32, #tpu.memory_space<vmem>>, vector<1x1x1x1xf32>
    %44 = vector.shape_cast %43 : vector<1x1x1x1xf32> to vector<1x1xf32>
    %45 = vector.shape_cast %42 : vector<1x1xf32> to vector<1x1x1x1xf32>
    tpu.vector_store %arg7[%c0_16, %c0_17, %c0_18, %c0_19], %45 {strides = array<i32>} : memref<1x1x1x1xf32, #tpu.memory_space<vmem>>, vector<1x1x1x1xf32>,
    %46 = arith.cmpf oeq, %34, %22 : vector<1x256xf32>
    %cst_20 = arith.constant 0.000000e+00 : f32
    %47 = vector.broadcast %cst_20 : f32 to vector<1x256xf32>
    %48 = arith.select %46, %28, %47 : vector<1x256xi1>, vector<1x256xf32>
    %c0_21 = arith.constant 0 : index
    %c0_22 = arith.constant 0 : index
    %c0_23 = arith.constant 0 : index
    %c0_24 = arith.constant 0 : index
    %49 = vector.load %arg5[%c0_21, %c0_22, %c0_23, %c0_24] : memref<1x1x4x1xf32, #tpu.memory_space<vmem>>, vector<1x1x4x1xf32>
    %50 = vector.shape_cast %49 : vector<1x1x4x1xf32> to vector<4x1xf32>
    %cst_25 = arith.constant 1.000000e+00 : f32
    %cst_26 = arith.constant 0.000000e+00 : f32
    %51 = vector.broadcast %cst_25 : f32 to vector<4x256xf32>
    %52 = vector.broadcast %cst_26 : f32 to vector<4x256xf32>
    %53 = arith.select %20, %51, %52 : vector<4x256xi1>, vector<4x256xf32>
    %cst_27 = arith.constant dense<0.000000e+00> : vector<4xf32>
    %54 = vector.multi_reduction <add>, %53, %cst_27 [1] : vector<4x256xf32> to vector<4xf32>
    %55 = vector.shape_cast %54 : vector<4xf32> to vector<4x1xf32>
    %56 = arith.addf %50, %55 : vector<4x1xf32>
    %c0_28 = arith.constant 0 : index
    %c0_29 = arith.constant 0 : index
    %c0_30 = arith.constant 0 : index
    %c0_31 = arith.constant 0 : index
    %57 = vector.load %arg5[%c0_28, %c0_29, %c0_30, %c0_31] : memref<1x1x4x1xf32, #tpu.memory_space<vmem>>, vector<1x1x4x1xf32>
    %58 = vector.shape_cast %57 : vector<1x1x4x1xf32> to vector<4x1xf32>
    %59 = vector.shape_cast %56 : vector<4x1xf32> to vector<1x1x4x1xf32>
    tpu.vector_store %arg5[%c0_28, %c0_29, %c0_30, %c0_31], %59 {strides = array<i32>} : memref<1x1x4x1xf32, #tpu.memory_space<vmem>>, vector<1x1x4x1xf32>,
    %c0_32 = arith.constant 0 : index
    %c0_33 = arith.constant 0 : index
    %c0_34 = arith.constant 0 : index
    %c0_35 = arith.constant 0 : index
    %60 = vector.load %arg6[%c0_32, %c0_33, %c0_34, %c0_35] : memref<1x1x4x1xf32, #tpu.memory_space<vmem>>, vector<1x1x4x1xf32>
    %61 = vector.shape_cast %60 : vector<1x1x4x1xf32> to vector<4x1xf32>
    %cst_36 = arith.constant 0.000000e+00 : f32
    %62 = vector.shape_cast %48 : vector<1x256xf32> to vector<1x256xf32>
    %63 = vector.broadcast %62 : vector<1x256xf32> to vector<4x256xf32>
    %64 = vector.broadcast %cst_36 : f32 to vector<4x256xf32>
    %65 = arith.select %20, %63, %64 : vector<4x256xi1>, vector<4x256xf32>
    %cst_37 = arith.constant dense<0.000000e+00> : vector<4xf32>
    %66 = vector.multi_reduction <add>, %65, %cst_37 [1] : vector<4x256xf32> to vector<4xf32>
    %67 = vector.shape_cast %66 : vector<4xf32> to vector<4x1xf32>
    %68 = arith.addf %61, %67 : vector<4x1xf32>
    %c0_38 = arith.constant 0 : index
    %c0_39 = arith.constant 0 : index
    %c0_40 = arith.constant 0 : index
    %c0_41 = arith.constant 0 : index
    %69 = vector.load %arg6[%c0_38, %c0_39, %c0_40, %c0_41] : memref<1x1x4x1xf32, #tpu.memory_space<vmem>>, vector<1x1x4x1xf32>
    %70 = vector.shape_cast %69 : vector<1x1x4x1xf32> to vector<4x1xf32>
    %71 = vector.shape_cast %68 : vector<4x1xf32> to vector<1x1x4x1xf32>
    tpu.vector_store %arg6[%c0_38, %c0_39, %c0_40, %c0_41], %71 {strides = array<i32>} : memref<1x1x4x1xf32, #tpu.memory_space<vmem>>, vector<1x1x4x1xf32>,
    %c0_i32_42 = arith.constant 0 : i32
    %72 = arith.cmpi eq, %arg2, %c0_i32_42 : i32
    %73 = arith.extui %72 : i1 to i32
    %c0_i32_43 = arith.constant 0 : i32
    %74 = arith.cmpi ne, %73, %c0_i32_43 : i32
    scf.if %74 {
      %c0_44 = arith.constant 0 : index
      %c0_45 = arith.constant 0 : index
      %c0_46 = arith.constant 0 : index
      %c0_47 = arith.constant 0 : index
      %75 = vector.load %arg5[%c0_44, %c0_45, %c0_46, %c0_47] : memref<1x1x4x1xf32, #tpu.memory_space<vmem>>, vector<1x1x4x1xf32>
      %cst_48 = arith.constant 3.906250e-03 : f32
      %76 = vector.broadcast %cst_48 : f32 to vector<1x1x4x1xf32>
      %77 = arith.mulf %75, %76 : vector<1x1x4x1xf32>
      %c0_49 = arith.constant 0 : index
      %c0_50 = arith.constant 0 : index
      %c0_51 = arith.constant 0 : index
      %c0_52 = arith.constant 0 : index
      %78 = vector.load %arg5[%c0_49, %c0_50, %c0_51, %c0_52] : memref<1x1x4x1xf32, #tpu.memory_space<vmem>>, vector<1x1x4x1xf32>
      tpu.vector_store %arg5[%c0_49, %c0_50, %c0_51, %c0_52], %77 {strides = array<i32>} : memref<1x1x4x1xf32, #tpu.memory_space<vmem>>, vector<1x1x4x1xf32>,
      %c0_53 = arith.constant 0 : index
      %c0_54 = arith.constant 0 : index
      %c0_55 = arith.constant 0 : index
      %c0_56 = arith.constant 0 : index
      %79 = vector.load %arg6[%c0_53, %c0_54, %c0_55, %c0_56] : memref<1x1x4x1xf32, #tpu.memory_space<vmem>>, vector<1x1x4x1xf32>
      %cst_57 = arith.constant 3.906250e-03 : f32
      %80 = vector.broadcast %cst_57 : f32 to vector<1x1x4x1xf32>
      %81 = arith.mulf %79, %80 : vector<1x1x4x1xf32>
      %c0_58 = arith.constant 0 : index
      %c0_59 = arith.constant 0 : index
      %c0_60 = arith.constant 0 : index
      %c0_61 = arith.constant 0 : index
      %82 = vector.load %arg6[%c0_58, %c0_59, %c0_60, %c0_61] : memref<1x1x4x1xf32, #tpu.memory_space<vmem>>, vector<1x1x4x1xf32>
      tpu.vector_store %arg6[%c0_58, %c0_59, %c0_60, %c0_61], %81 {strides = array<i32>} : memref<1x1x4x1xf32, #tpu.memory_space<vmem>>, vector<1x1x4x1xf32>,
    } else {
    }
    return
  }
  func.func @transform_0(%arg0: i32, %arg1: i32, %arg2: i32) -> (i32, i32, i32) {
    %c1_i32 = arith.constant 1 : i32
    %0 = arith.muli %arg0, %c1_i32 : i32
    %1 = arith.addi %0, %arg2 : i32
    %c0_i32 = arith.constant 0 : i32
    %2 = arith.minsi %1, %c0_i32 : i32
    %c0_i32_0 = arith.constant 0 : i32
    %c0_i32_1 = arith.constant 0 : i32
    return %arg1, %c0_i32_0, %2 : i32, i32, i32
  }
  func.func @transform_1(%arg0: i32, %arg1: i32, %arg2: i32) -> (i32, i32, i32) {
    %c1_i32 = arith.constant 1 : i32
    %0 = arith.muli %arg0, %c1_i32 : i32
    %1 = arith.addi %0, %arg2 : i32
    %c0_i32 = arith.constant 0 : i32
    %2 = arith.minsi %1, %c0_i32 : i32
    %c0_i32_0 = arith.constant 0 : i32
    %c0_i32_1 = arith.constant 0 : i32
    return %arg1, %c0_i32_0, %2 : i32, i32, i32
  }
  func.func @transform_2(%arg0: i32, %arg1: i32, %arg2: i32) -> (i32, i32, i32, i32) {
    %c0_i32 = arith.constant 0 : i32
    %c0_i32_0 = arith.constant 0 : i32
    %c0_i32_1 = arith.constant 0 : i32
    return %arg0, %arg1, %c0_i32, %c0_i32_0 : i32, i32, i32, i32
  }
  func.func @transform_3(%arg0: i32, %arg1: i32, %arg2: i32) -> (i32, i32, i32, i32) {
    %c0_i32 = arith.constant 0 : i32
    %c0_i32_0 = arith.constant 0 : i32
    %c0_i32_1 = arith.constant 0 : i32
    return %arg0, %arg1, %c0_i32, %c0_i32_0 : i32, i32, i32, i32
  }
  func.func @transform_4(%arg0: i32, %arg1: i32, %arg2: i32) -> (i32, i32, i32, i32) {
    %c0_i32 = arith.constant 0 : i32
    %c0_i32_0 = arith.constant 0 : i32
    %c0_i32_1 = arith.constant 0 : i32
    return %arg0, %arg1, %c0_i32, %c0_i32_0 : i32, i32, i32, i32
  }
}

</mosaic_0001>

<bundles_post_ra>
// kernel: tpu_custom_call.1
= control target key start
LH: loop header
LB: loop body
LE: loop exit
PB: predicated region body
PF: predicated region fallthrough
CT: control target
= control target key end

     0   :  { %10 = vsyncpa [#allocation3], 0  ;;  %s1195_s0 = inlined_call_operand.hbm [shape: f32[2,4,256], index: 0, kind: input, shape index: {}]   ;;  %s1196_s1 = inlined_call_operand.hbm [shape: s32[2,1,256], index: 1, kind: input, shape index: {}]   ;;  %s1197_s2 = inlined_call_operand.vmem [shape: f32[1,2,4,1], index: 2, kind: output, shape index: {0}]   ;;  %s1198_s3 = inlined_call_operand.vmem [shape: f32[1,2,4,1], index: 3, kind: output, shape index: {1}]   ;;  %s1199_s4 = inlined_call_operand.vmem [shape: f32[1,2,1,1], index: 4, kind: output, shape index: {2}]  }
   0x1   :  { %12 = vsyncpa [#allocation3 + $0x1], 0 }
   0x2   :  { %13 = vsyncpa [#allocation5], 0 }
   0x3   :  { %15 = vsyncpa [#allocation5 + $0x1], 0  ;;  %s948_s15 = smov 0   ;;  %s950_s16 = smov 0  }
   0x4   :  { %s952_s17 = smov 0   ;;  %s954_s18 = smov 0  }
   0x5   :  { %s956_s19 = smov 0   ;;  %s958_s20 = smov 0  }
   0x6 LB: > { %s713_s21 = sadd.s32 4294967295, %s918_s20   ;;  %s36_s22 = sadd.s32 1, %s914_s19  ;;  %s918_s20 = sphi %s958_s20, %s21_s20   ;;  %s914_s19 = sphi %s956_s19, %s1213_s19   ;;  %s910_s18 = sphi %s954_s18, %s1212_s18   ;;  %s906_s17 = sphi %s952_s17, %s1211_s17   ;;  %s902_s16 = sphi %s950_s16, %s1210_s16   ;;  %s898_s15 = sphi %s948_s15, %s1209_s15  }
   0x7   : > { %p38_p0 = scmp.ge.s32.totalorder %s36_s22, 2  ;;  %s55_s23 = sadd.s32 1, %s906_s17 }
   0x8   : > { %p62_p1 = scmp.ne.s32.totalorder %s906_s17, %s902_s16  ;;  %p63_p2 = scmp.eq.s32.totalorder %s918_s20, 0 }
   0x9   : > { %s1215_s22 = smov (%p38_p0, %s36_s22), 0  ;;  %p68_p4 = scmp.ne.s32.totalorder %s902_s16, %s898_s15 }
   0xa   : > { %p984_p3 = por %p63_p2, %p62_p1  ;;  %s50_s25 = ssub.s32 %s914_s19, %s1215_s22 }
   0xb   : > { %p69_p5 = scmp.eq.s32.totalorder %s713_s21, 0  ;;  %p53_p6 = scmp.eq.s32.totalorder %s50_s25, 0 }
   0xc   : > { %p743_p8 = scmp.lt.s32.totalorder %s918_s20, 2  ;;  %s1000_s28 = sand.u32 1, %s906_s17  }
   0xd   : > { %p991_p7 = por %p69_p5, %p68_p4  ;;  %s730_s29 = sshll.u32 %s914_s19, 7 }
   0xe   : > { %s997_s27 = scalar_select %p53_p6, %s906_s17, %s55_s23  }
   0xf   : > { %s1202_s26 = scalar_select %p991_p7, 1, 0 }
  0x10   : > { %s717_s30 = sshll.u32 %s1000_s28, 3  ;;  %s1007_s7 = scalar_lea.hbm %s1195_s0, %s730_s29 }
  0x11   : > { %s214_s8 = scalar_lea.vmem [#allocation2], %s717_s30  ;;  %p1011_p9 = pnand %p743_p8, %p984_p3 }
  0x12   : > { %s227_s9 = sshll.u32 %s214_s8, 4  ;;  %s211_s11 = scalar_lea.sflag [#allocation3], %s1000_s28  ;;  %s1015_s9 = int_to_ptr.vmem [resolvable:$true] %s227_s9 }
  0x13   : > { %s804_s12 = scalar_lea.hbm %s1007_s7, 128  ;;  %p806_p13 = pneg %p1011_p9 }
  0x14   : > { %p805_p12 = scmp.ne.s32.totalorder %s1007_s7, %s804_s12  ;;  %s809_s15 = scalar_lea.hbm %s1195_s0, 256 }
  0x15   : > { %p810_p2 = scmp.lt.u32.totalorder %s1007_s7, %s1195_s0  ;;  %p811_p3 = scmp.lt.u32.totalorder %s809_s15, %s804_s12 }
  0x16   : > { %p807_p0 = pnand %p806_p13, %p805_p12  ;;  %p813_p5 = scmp.lt.u32.totalorder %s804_s12, %s1007_s7 }
  0x17   : > { %p812_p4 = por %p811_p3, %p810_p2 }
  0x18   : > { %p808_p1 = pneg %p807_p0 }
  0x19   : > { %p814_p6 = por %p813_p5, %p812_p4 }
  0x1b   : > { %p815_p8 = pnand %p814_p6, %p808_p1 }
  0x1d   : > { %818 = shalt.err (!%p815_p8)
}
  0x1e   : > { %s819_s24 = scalar_lea.vmem %s1015_s9, 128  ;;  %s920_s25 = smov [#allocation2]  }
  0x1f   : > { %p820_p12 = scmp.ne.s32.totalorder %s1015_s9, %s819_s24  ;;  %s824_s29 = sshll.u32 %s920_s25, 4  ;;  %s825_s29 = int_to_ptr.vmem [resolvable:$false] %s824_s29 }
  0x20   : > { %s826_s30 = scalar_lea.vmem %s825_s29, 256  ;;  %p827_p11 = scmp.lt.s32.totalorder %s1015_s9, %s825_s29 }
  0x21   : > { %p822_p0 = pnand %p820_p12, %p806_p13  ;;  %p828_p2 = scmp.lt.s32.totalorder %s826_s30, %s819_s24 }
  0x23   : > { %p823_p10 = pneg %p822_p0  ;;  %p829_p3 = por %p828_p2, %p827_p11 }
  0x25   : > { %p830_p4 = pnand %p829_p3, %p823_p10 }
  0x27   : > { %833 = shalt.err (!%p830_p4)
}
  0x28   : > { %739 = dma.hbm_to_vmem [thread:$0]  (!%p1011_p9), %s1007_s7, 128, %s1015_s9, %s211_s11  }
  0x29   : > { %p1204_p1 = scmp.lt.s32.totalorder %s918_s20, 3  ;;  %p1205_p5 = scmp.ge.s32.totalorder %s918_s20, 1 }
  0x2a   : > { %s720_s6 = sshll.u32 %s1000_s28, 1  ;;  %s731_s8 = sshll.u32 %s914_s19, 5 }
  0x2b   : > { %p1049_p6 = pnand %p1205_p5, %p1204_p1  ;;  %s1058_s14 = scalar_lea.hbm %s1196_s1, %s731_s8 }
  0x2c   : > { %s238_s15 = scalar_lea.vmem [#allocation4], %s720_s6  ;;  %s235_s7 = scalar_lea.sflag [#allocation5], %s1000_s28 }
  0x2d   : > { %s1206_s5 = scalar_select %p1049_p6, 1, 0 }
  0x2e   : > { %s251_s21 = sshll.u32 %s238_s15, 4  ;;  %s834_s9 = scalar_lea.hbm %s1058_s14, 32  ;;  %s252_s21 = int_to_ptr.vmem [resolvable:$true] %s251_s21 }
  0x2f   : > { %p835_p10 = scmp.ne.s32.totalorder %s1058_s14, %s834_s9  ;;  %s839_s24 = scalar_lea.hbm %s1196_s1, 64 }
  0x30   : > { %p840_p12 = scmp.lt.u32.totalorder %s1058_s14, %s1196_s1  ;;  %p841_p0 = scmp.lt.u32.totalorder %s839_s24, %s834_s9 }
  0x31   : > { %p837_p11 = pnand %p835_p10, %p806_p13  ;;  %p843_p3 = scmp.lt.u32.totalorder %s834_s9, %s1058_s14 }
  0x32   : > { %p842_p2 = por %p841_p0, %p840_p12 }
  0x33   : > { %p838_p8 = pneg %p837_p11 }
  0x34   : > { %p844_p4 = por %p843_p3, %p842_p2 }
  0x36   : > { %p845_p1 = pnand %p844_p4, %p838_p8 }
  0x38   : > { %848 = shalt.err (!%p845_p1)
}
  0x39   : > { %s849_s28 = scalar_lea.vmem %s252_s21, 32  ;;  %s921_s30 = smov [#allocation4]  }
  0x3a   : > { %p850_p5 = scmp.ne.s32.totalorder %s252_s21, %s849_s28  ;;  %s854_s6 = sshll.u32 %s921_s30, 4  ;;  %s855_s6 = int_to_ptr.vmem [resolvable:$false] %s854_s6 }
  0x3b   : > { %s856_s8 = scalar_lea.vmem %s855_s6, 64  ;;  %p857_p7 = scmp.lt.s32.totalorder %s252_s21, %s855_s6 }
  0x3c   : > { %p852_p10 = pnand %p850_p5, %p806_p13  ;;  %p858_p6 = scmp.lt.s32.totalorder %s856_s8, %s849_s28 }
  0x3e   : > { %p853_p11 = pneg %p852_p10  ;;  %p859_p0 = por %p858_p6, %p857_p7 }
  0x40   : > { %p860_p12 = pnand %p859_p0, %p853_p11 }
  0x42   : > { %863 = shalt.err (!%p860_p12)
}
  0x43   : > { %742 = dma.hbm_to_vmem [thread:$0]  (!%p1011_p9), %s1058_s14, 32, %s252_s21, %s235_s7  }
  0x44   : > { %p1207_p8 = scmp.ne.s32.totalorder %s1206_s5, 0 }
  0x45   : > { %s262_s12 = sand.u32 (!%p1207_p8), 1, %s902_s16   ;;  %p1208_p13 = scmp.ne.s32.totalorder (!%p1207_p8), %s1202_s26, 0 }
  0x46   : > { %260 = sbr.rel (%p1207_p8) target bundleno = 300 (0x12c), region = 28  ;;  %s724_s13 = sshll.u32 (!%p1207_p8), %s262_s12, 3 }
  0x47   : > { %s263_s15 = scalar_lea.sflag (!%p1207_p8), [#allocation3], %s262_s12  ;;  %s266_s9 = scalar_lea.vmem (!%p1207_p8), [#allocation2], %s724_s13 }
  0x4d   : > { %889 = dma.done.wait (%p1208_p13), %s263_s15, 128  }
  0x4e   : > { %891 = vsyncadd (%p1208_p13), %s263_s15, 4294967168  ;;  %s725_s11 = sshll.u32 %s262_s12, 1  ;;  %s272_s23 = scalar_lea.sflag [#allocation5], %s262_s12 }
  0x4f   : > { %s275_s10 = scalar_lea.vmem [#allocation4], %s725_s11 }
  0x50   : > { %893 = dma.done.wait (%p1208_p13), %s272_s23, 32  }
  0x51   : > { %895 = vsyncadd (%p1208_p13), %s272_s23, 4294967264  ;;  %v375_v0 = vlaneseq  ;;  %p333_p7 = scmp.lt.s32.totalorder %s910_s18, 1  ;;  %vm358_vm0 = vcmask 3072   ;;  %vm396_vm1 = vcmask 1043456   ;;  %v922_v4 = vmov 0.0   ;;  %v373_v6 = vld [vmem:[%s266_s9] sm:$0xff] }
  0x52   : > { %v374_v5 = vld [vmem:[%s275_s10] sm:$0x3]  ;;  %v394_v9 = vcombine.high %v373_v6, %v373_v6  ;;  %v397_v10 = vsel %vm396_vm1, %v373_v6, -inf  ;;  %vm361_vm6 = vcmask 0  }
  0x53   : > { %v1092_v1 = vshrl.u32 %v375_v0, 7  ;;  %s1217_s18 = smov (!%p333_p7, %s910_s18), 1  ;;  %v398_v11 = vrot.slane %v397_v10, 4 }
  0x54   : > { %s726_s5 = sshll.u32 %s1217_s18, 2  ;;  %v404_v12 = vsel %vm396_vm1, %v394_v9, -inf  ;;  %s353_s30 = scalar_lea.vmem %s1199_s4, %s1217_s18 }
  0x55   : > { %v379_v2 = vsub.s32 0, %v1092_v1  ;;  %v383_v3 = vsub.s32 1, %v1092_v1  ;;  %s1105_s21 = scalar_lea.vmem %s1197_s2, %s726_s5  ;;  %v405_v15 = vrot.slane %v404_v12, 4  ;;  %v399_v20 = vmax.f32 %v397_v10, %v398_v11  ;;  %s1144_s25 = scalar_lea.vmem %s1198_s3, %s726_s5  ;;  %362 = vst.msk [vmem:[%s353_s30] sm:$0x1] %vm361_vm6, %v922_v4 }
  0x56   : > { %359 = vst.msk [vmem:[%s1105_s21] sm:$0xf] %vm358_vm0, %v922_v4  ;;  %360 = vst.msk [vmem:[%s1144_s25] sm:$0xf] %vm358_vm0, %v922_v4 }
  0x57   : > { %v1110_v7 = vrot.slane %v374_v5, %v379_v2  ;;  %v1112_v8 = vrot.slane %v374_v5, %v383_v3  ;;  %v406_v19 = vmax.f32 %v404_v12, %v405_v15  ;;  %v400_v22 = vrot.slane %v399_v20, 2 }
  0x59   : > { %vm385_vm2 = vcmp.eq.s32.totalorder %v1110_v7, %v1092_v1  ;;  %vm386_vm3 = vcmp.eq.s32.totalorder %v1112_v8, %v1092_v1  ;;  %v407_v21 = vrot.slane %v406_v19, 2  ;;  %v401_v24 = vmax.f32 %v399_v20, %v400_v22 }
  0x5a   : > { %v475_v13 = vsel %vm385_vm2, 1.0, %v922_v4  ;;  %v476_v14 = vsel %vm386_vm3, 1.0, %v922_v4  ;;  %v443_v32 = vsel %vm385_vm2, %v373_v6, 0.0  ;;  %v444_v33 = vsel %vm386_vm3, %v394_v9, 0.0 }
  0x5b   : > { %v477_v16 = vsel %vm396_vm1, %v475_v13, 0.0  ;;  %v478_v17 = vsel %vm396_vm1, %v476_v14, 0.0  ;;  %v408_v23 = vmax.f32 %v406_v19, %v407_v21  ;;  %v402_v26 = vrot.slane %v401_v24, 1 }
  0x5c   : > { %v479_v18 = vadd.f32 %v478_v17, %v477_v16  ;;  %v445_v34 = vsel %vm396_vm1, %v443_v32, 0.0  ;;  %v452_v35 = vsel %vm396_vm1, %v444_v33, 0.0 }
  0x5d   : > { %v409_v25 = vrot.slane %v408_v23, 1  ;;  %v403_v28 = vmax.f32 %v401_v24, %v402_v26  ;;  %v446_v36 = vrot.slane %v445_v34, 4  ;;  %v453_v38 = vrot.slane %v452_v35, 4  ;;  %v474_v1 = vld [vmem:[%s1105_s21] sm:$0xf] }
  0x5e   : > { %480 = vadd.xlane.f32.xlu0 %v479_v18  ;;  %v485_v24 = vld [vmem:[%s1144_s25] sm:$0xf] }
  0x5f   : > { %v410_v27 = vmax.f32 %v408_v23, %v409_v25  ;;  %v447_v41 = vadd.f32 %v446_v36, %v445_v34  ;;  %v454_v44 = vadd.f32 %v453_v38, %v452_v35 }
  0x61   : > { %v413_v29 = vcombine.low %v403_v28, %v410_v27  ;;  %v448_v47 = vrot.slane %v447_v41, 2  ;;  %v455_v50 = vrot.slane %v454_v44, 2 }
  0x63   : > { %v415_v30 = vsub.f32 %v373_v6, %v413_v29  ;;  %v449_v55 = vadd.f32 %v448_v47, %v447_v41  ;;  %v456_v58 = vadd.f32 %v455_v50, %v454_v44 }
  0x65   : > { %v416_v31 = vmul.f32 1.442695, %v415_v30  ;;  %v450_v60 = vrot.slane %v449_v55, 1  ;;  %v457_v61 = vrot.slane %v456_v58, 1 }
  0x67   : > { %794 = vpow2.f32 %v416_v31  ;;  %v451_v62 = vadd.f32 %v450_v60, %v449_v55  ;;  %v458_v63 = vadd.f32 %v457_v61, %v456_v58 }
  0x69   : > { %vm470_vm4 = vcmp.eq.f32.partialorder %v451_v62, %v403_v28  ;;  %vm471_vm5 = vcmp.eq.f32.partialorder %v458_v63, %v410_v27 }
  0x71   : > { %v795_v37 = vpop.eup %794 }
  0x72   : > { %v419_v39 = vcombine.high %v795_v37, %v795_v37  ;;  %v421_v40 = vsel %vm396_vm1, %v795_v37, 0.0 }
  0x73   : > { %v422_v42 = vrot.slane %v421_v40, 4 }
  0x74   : > { %v428_v43 = vsel %vm396_vm1, %v419_v39, 0.0 }
  0x75   : > { %v423_v45 = vadd.f32 %v422_v42, %v421_v40  ;;  %v429_v46 = vrot.slane %v428_v43, 4 }
  0x77   : > { %v424_v48 = vrot.slane %v423_v45, 2  ;;  %v430_v49 = vadd.f32 %v429_v46, %v428_v43 }
  0x79   : > { %v425_v51 = vadd.f32 %v424_v48, %v423_v45  ;;  %v431_v52 = vrot.slane %v430_v49, 2 }
  0x7b   : > { %v426_v53 = vrot.slane %v425_v51, 1  ;;  %v432_v54 = vadd.f32 %v431_v52, %v430_v49 }
  0x7d   : > { %v427_v56 = vadd.f32 %v426_v53, %v425_v51  ;;  %v433_v57 = vrot.slane %v432_v54, 1 }
  0x7f   : > { %v434_v59 = vadd.f32 %v433_v57, %v432_v54  ;;  %796 = vrcp.f32 %v427_v56 }
  0x80   : > { %798 = vlog2.f32 %v427_v56 }
  0x81   : > { %800 = vrcp.f32 %v434_v59 }
  0x82   : > { %802 = vlog2.f32 %v434_v59 }
  0x89   : > { %v797_v0 = vpop.eup %796 }
  0x8a   : > { %v799_v2 = vpop.eup %798  ;;  %v472_v3 = vsel %vm470_vm4, %v797_v0, 0.0 }
  0x8b   : > { %v801_v5 = vpop.eup %800  ;;  %v486_v6 = vsel %vm385_vm2, %v472_v3, 0.0  ;;  %v438_v9 = vmul.f32 0.6931472, %v799_v2 }
  0x8c   : > { %v803_v10 = vpop.eup %802  ;;  %v473_v11 = vsel %vm471_vm5, %v801_v5, 0.0  ;;  %v488_v12 = vsel %vm396_vm1, %v486_v6, 0.0 }
  0x8d   : > { %v487_v13 = vsel %vm386_vm3, %v473_v11, 0.0  ;;  %v440_v14 = vmul.f32 0.6931472, %v803_v10  ;;  %v441_v15 = vadd.f32 %v438_v9, %v403_v28 }
  0x8e   : > { %v489_v16 = vsel %vm396_vm1, %v487_v13, 0.0 }
  0x8f   : > { %v490_v17 = vadd.f32 %v489_v16, %v488_v12  ;;  %v442_v7 = vadd.f32 %v440_v14, %v410_v27  ;;  %v459_v18 = vsub.f32 %v441_v15, %v451_v62  ;;  %v463_v27 = vld [vmem:[%s353_s30] sm:$0x1] }
  0x91   : > { %491 = vadd.xlane.f32.xlu0 %v490_v17  ;;  %v460_v19 = vsub.f32 %v442_v7, %v458_v63 }
  0x93   : > { %v464_v20 = vadd.f32 %v460_v19, %v459_v18 }
  0x95   : > { %465 = vadd.xlane.f32.xlu1 %v464_v20 }
  0xeb   : > { %v481_v8 = vpop.xlane.xlu0 %480 }
  0xec   : > { %v482_v21 = vadd.f32 %v481_v8, %v474_v1 }
  0xee   : > { %484 = vst.msk [vmem:[%s1105_s21] sm:$0xf] %vm358_vm0, %v482_v21 }
  0xf5   : > { %v498_v22 = vld [vmem:[%s1105_s21] sm:$0xf] }
  0xf6   : > { %v499_v23 = vmul.f32 0.00390625, %v498_v22 }
  0xf8   : > { %500 = vst.msk [vmem:[%s1105_s21] sm:$0xf] %vm358_vm0, %v499_v23 }
 0x11e   : > { %v492_v25 = vpop.xlane.xlu0 %491 }
 0x11f   : > { %v493_v26 = vadd.f32 %v492_v25, %v485_v24 }
 0x121   : > { %494 = vst.msk [vmem:[%s1144_s25] sm:$0xf] %vm358_vm0, %v493_v26 }
 0x122   : > { %v466_v28 = vpop.xlane.xlu1 %465 }
 0x123   : > { %v467_v29 = vadd.f32 %v466_v28, %v463_v27 }
 0x125   : > { %469 = vst.msk [vmem:[%s353_s30] sm:$0x1] %vm361_vm6, %v467_v29 }
 0x128   : > { %v501_v4 = vld [vmem:[%s1144_s25] sm:$0xf] }
 0x129   : > { %v502_v30 = vmul.f32 0.00390625, %v501_v4 }
 0x12b   : > { %503 = vst.msk [vmem:[%s1144_s25] sm:$0xf] %vm358_vm0, %v502_v30 }
 0x12c PF: > { %s21_s20 = sadd.s32 1, %s918_s20   ;;  %s1209_s15 = smov %s902_s16 }
 0x12d   : > { %p18_p9 = scmp.ge.s32.totalorder %s21_s20, 4   ;;  %s1210_s16 = smov %s906_s17 }
 0x12e   : > { %s1211_s17 = smov %s997_s27  ;;  %s1212_s18 = smov %s914_s19 }
 0x12f   : > { %s1213_s19 = smov %s1215_s22  ;;  %20 = sbr.rel (!%p18_p9) target bundleno = 6 (0x6), region = 113 }
 0x136   :  { %573 = vsyncpa [#allocation3], 1 }
 0x137   :  { %575 = vsyncpa [#allocation3 + $0x1], 1 }
 0x138   :  { %576 = vsyncpa [#allocation5], 1 }
 0x139   :  { %578 = vsyncpa [#allocation5 + $0x1], 1 }

</bundles_post_ra>
